<compile_context>
chip_gen: v5e
topology: v5e:2x2
jax: 0.10.0
libtpu: 0.0.40
codegen_flags: <defaults>
</compile_context>

<pallas_src>
from functools import partial

import jax
import jax.numpy as jnp
from jax.experimental import pallas as pl
from jax.experimental.pallas import tpu as pltpu

LANE = 128  # lane-dense width: fused-head output columns AND padded hidden dim
SUB = 8     # f32 sublane quantum


def _round_up(n, m):
    return ((n + m - 1) // m) * m


def policy_kernel(x_ref, p_ref, out_ref, *, s, sp, hp):
    """Fused fc1+ReLU+heads.  Packed parameter row layout (all LANE wide):
         [0        : sp        )  w1t  (state -> hidden), zero-padded
         [sp       : sp+SUB    )  b1   (row 0 valid)
         [sp+SUB   : sp+SUB+hp )  wh   fused actor+critic head, zero-padded
         [sp+SUB+hp: sp+2*SUB+hp) bh   (row 0 valid)
       All slice starts are multiples of 8 -> zero-cost (8,128)-aligned views.
    """
    r_b1 = sp
    r_wh = sp + SUB
    r_bh = sp + SUB + hp

    x = x_ref[...]                                # (B, S)
    w1 = p_ref[0:s, :]                            # (S, 128)
    b1 = p_ref[r_b1:r_b1 + 1, :]                  # (1, 128)
    wh = p_ref[r_wh:r_bh, :]                      # (128, 128)
    bh = p_ref[r_bh:r_bh + 1, :]                  # (1, 128)

    # fc1 + ReLU (h stays in vregs; exactly one (8,128) vreg for B=8)
    h = jnp.maximum(jnp.dot(x, w1, preferred_element_type=jnp.float32) + b1, 0.0)
    # Fused actor+critic heads: single native K=128 MXU pass.
    out_ref[...] = jnp.dot(h, wh, preferred_element_type=jnp.float32) + bh


def init_policy_params(key, state_space, action_space, hidden=16):
    """Mirrors Policy.init_weights(): normal_(weight), zeros_(bias), sigma=10.
       Weights stored PyTorch-style as (out, in)."""
    k1, k2, k3 = jax.random.split(key, 3)
    return {
        "w1": jax.random.normal(k1, (hidden, state_space), jnp.float32),
        "b1": jnp.zeros((hidden,), jnp.float32),
        "w2": jax.random.normal(k2, (action_space, hidden), jnp.float32),
        "b2": jnp.zeros((action_space,), jnp.float32),
        "wc": jax.random.normal(k3, (1, hidden), jnp.float32),
        "bc": jnp.zeros((1,), jnp.float32),
        "sigma": jnp.array([10.0], jnp.float32),
    }


def prepare_policy_params(params, lane=LANE):
    """One-time packing: transpose to (in, out), fuse actor+critic heads,
       zero-pad hidden to 128, and stack everything into ONE lane-dense
       (Sp + 8 + 128 + 8, 128) parameter buffer."""
    H, S = params["w1"].shape
    A = params["w2"].shape[0]
    assert A + 1 <= lane, "fused head width (A+1) must fit in one lane group"

    Sp = _round_up(S, SUB)   # padded state rows (8-aligned slice boundaries)
    Hp = lane                # hidden padded to 128 -> native layouts everywhere

    w1t = jnp.zeros((Sp, Hp), jnp.float32).at[:S, :H].set(params["w1"].T)
    b1 = jnp.zeros((SUB, Hp), jnp.float32).at[0, :H].set(params["b1"])

    w_heads = jnp.concatenate([params["w2"].T, params["wc"].T], axis=1)  # (H, A+1)
    wh = jnp.zeros((Hp, lane), jnp.float32).at[:H, :A + 1].set(w_heads)
    b_heads = jnp.concatenate([params["b2"], params["bc"]])              # (A+1,)
    bh = jnp.zeros((SUB, lane), jnp.float32).at[0, :A + 1].set(b_heads)

    packed = jnp.concatenate([w1t, b1, wh, bh], axis=0)  # (Sp+8+128+8, 128)

    return {
        "packed": packed,
        "sigma": params["sigma"],      # consumed host-side by Normal(mean, sigma)
        "state_space": S,
        "state_space_padded": Sp,
        "hidden_padded": Hp,
        "action_space": A,
    }


@partial(jax.jit, static_argnames=("s", "sp", "hp"))
def _policy_forward_jit(x, packed, s, sp, hp):
    """Hot path: one pallas_call, two input DMAs, one lane-dense output slab.
       No post-kernel slice glue lives here (consumer carves the slab)."""
    B = x.shape[0]
    vmem = pl.BlockSpec(memory_space=pltpu.MemorySpace.VMEM)
    return pl.pallas_call(
        partial(policy_kernel, s=s, sp=sp, hp=hp),
        out_shape=jax.ShapeDtypeStruct((B, LANE), jnp.float32),
        in_specs=[vmem, vmem],
        out_specs=vmem,
    )(x, packed)


def policy_forward(x, prepped):
    """Returns (out_slab, sigma, action_space).
       out_slab[:, :A] = action_mean, out_slab[:, A] = state_value."""
    out = _policy_forward_jit(
        x, prepped["packed"],
        prepped["state_space"], prepped["state_space_padded"],
        prepped["hidden_padded"])
    return out, prepped["sigma"], prepped["action_space"]


def unpack_policy_output(out_slab, sigma, action_space):
    """Consumer-side carving of the slab (keep it inside the consumer's jit
       in a real training loop)."""
    mean = out_slab[:, :action_space]
    value = out_slab[:, action_space:action_space + 1]
    sigma_b = jnp.broadcast_to(sigma.reshape(1, 1), mean.shape)
    return mean, value, sigma_b


def policy_forward_ref(x, params):
    """Pure-JAX reference matching the PyTorch forward."""
    h = jax.nn.relu(x @ params["w1"].T + params["b1"])
    mean = h @ params["w2"].T + params["b2"]
    value = h @ params["wc"].T + params["bc"]
    sigma = jnp.broadcast_to(params["sigma"], mean.shape)
    return mean, value, sigma


if __name__ == "__main__":
    state_space = 4
    action_space = 2
    batch = 8

    key = jax.random.PRNGKey(0)
    k_params, k_x = jax.random.split(key)

    params = init_policy_params(k_params, state_space, action_space, hidden=16)
    prepped = prepare_policy_params(params)     # one-time packing (cached)
    x = jax.random.normal(k_x, (batch, state_space), jnp.float32)

    out_slab, sigma, A = policy_forward(x, prepped)
    jax.block_until_ready(out_slab)

    mean, value, sigma_b = unpack_policy_output(out_slab, sigma, A)
    mean_r, value_r, sigma_r = policy_forward_ref(x, params)

    assert out_slab.shape == (batch, LANE)
    assert mean.shape == (batch, action_space)
    assert value.shape == (batch, 1)
    assert sigma_b.shape == (batch, action_space)
    assert jnp.allclose(mean, mean_r, atol=1e-4, rtol=1e-4)
    assert jnp.allclose(value, value_r, atol=1e-4, rtol=1e-4)
    assert jnp.allclose(sigma_b, sigma_r)
    # padded columns of the slab must be exactly zero (weights/bias zero-padded)
    assert jnp.allclose(out_slab[:, action_space + 1:], 0.0)

    print("KERNEL_OK")
</pallas_src>

<mosaic_0001>
module attributes {stable_mosaic.version = 11 : i64} {
  func.func @policy_kernel(%arg0: memref<8x4xf32, #tpu.memory_space<vmem>>, %arg1: memref<152x128xf32, #tpu.memory_space<vmem>>, %arg2: memref<8x128xf32, #tpu.memory_space<vmem>>) attributes {dimension_semantics = [], scalar_prefetch = 0 : i64, scratch_operands = 0 : i64, tpu.core_type = #tpu.core_type<tc>} {
    %c0 = arith.constant 0 : index
    %c0_0 = arith.constant 0 : index
    %0 = vector.load %arg0[%c0, %c0_0] : memref<8x4xf32, #tpu.memory_space<vmem>>, vector<8x4xf32>
    %c0_1 = arith.constant 0 : index
    %c0_2 = arith.constant 0 : index
    %1 = vector.load %arg1[%c0_1, %c0_2] : memref<152x128xf32, #tpu.memory_space<vmem>>, vector<4x128xf32>
    %c8 = arith.constant 8 : index
    %c0_3 = arith.constant 0 : index
    %2 = vector.load %arg1[%c8, %c0_3] : memref<152x128xf32, #tpu.memory_space<vmem>>, vector<1x128xf32>
    %c16 = arith.constant 16 : index
    %c0_4 = arith.constant 0 : index
    %3 = vector.load %arg1[%c16, %c0_4] : memref<152x128xf32, #tpu.memory_space<vmem>>, vector<128x128xf32>
    %c144 = arith.constant 144 : index
    %c0_5 = arith.constant 0 : index
    %4 = vector.load %arg1[%c144, %c0_5] : memref<152x128xf32, #tpu.memory_space<vmem>>, vector<1x128xf32>
    %cst = arith.constant dense<0.000000e+00> : vector<8x128xf32>
    %5 = tpu.matmul %0, %1, %cst {dimension_numbers = #tpu.dot_dimension_numbers<[1], [0], [0], [1], [0, 0, 1, 1], [], []>} : vector<8x4xf32>, vector<4x128xf32>, vector<8x128xf32> -> vector<8x128xf32>
    %6 = vector.broadcast %2 : vector<1x128xf32> to vector<8x128xf32>
    %7 = arith.addf %5, %6 : vector<8x128xf32>
    %cst_6 = arith.constant 0.000000e+00 : f32
    %8 = vector.broadcast %cst_6 : f32 to vector<8x128xf32>
    %9 = arith.maximumf %7, %8 : vector<8x128xf32>
    %cst_7 = arith.constant dense<0.000000e+00> : vector<8x128xf32>
    %10 = tpu.matmul %9, %3, %cst_7 {dimension_numbers = #tpu.dot_dimension_numbers<[1], [0], [0], [1], [0, 0, 1, 1], [], []>} : vector<8x128xf32>, vector<128x128xf32>, vector<8x128xf32> -> vector<8x128xf32>
    %11 = vector.broadcast %4 : vector<1x128xf32> to vector<8x128xf32>
    %12 = arith.addf %10, %11 : vector<8x128xf32>
    %c0_8 = arith.constant 0 : index
    %c0_9 = arith.constant 0 : index
    %13 = vector.load %arg2[%c0_8, %c0_9] : memref<8x128xf32, #tpu.memory_space<vmem>>, vector<8x128xf32>
    tpu.vector_store %arg2[%c0_8, %c0_9], %12 {strides = array<i32>} : memref<8x128xf32, #tpu.memory_space<vmem>>, vector<8x128xf32>,
    return
  }
}

</mosaic_0001>

<bundles_post_ra>
// kernel: _policy_forward_jit.1
= control target key start
LH: loop header
LB: loop body
LE: loop exit
PB: predicated region body
PF: predicated region fallthrough
CT: control target
= control target key end

     0   :  { %7 = vsyncpa [#allocation3], 0  ;;  %s205_s0 = inlined_call_operand.vmem [shape: f32[8,4], index: 0, kind: input, shape index: {}]   ;;  %s206_s1 = inlined_call_operand.hbm [shape: f32[152,128], index: 1, kind: input, shape index: {}]   ;;  %s207_s2 = inlined_call_operand.hbm [shape: f32[8,128], index: 2, kind: output, shape index: {}]  }
   0x1   :  { %8 = vsyncpa [#allocation4], 0  ;;  %s15_s11 = sshll.u32 %s206_s1, 4  ;;  %s177_s12 = smov [#allocation2]   ;;  %s16_s11 = int_to_ptr.hbm [resolvable:$true] %s15_s11 }
   0x2   :  { %s17_s13 = sshll.u32 %s177_s12, 4  ;;  %s178_s14 = smov 128   ;;  %s18_s13 = int_to_ptr.vmem [resolvable:$true] %s17_s13 }
   0x3   :  { %s179_s15 = smov 8  }
   0x4   :  { %23 = dma.hbm_to_vmem [thread:$0]  %s16_s11, 2432, %s18_s13, [#allocation3], %s178_s14, %s178_s14, %s179_s15  }
   0x5   :  { %173 = dma.done.wait [#allocation3], 2432  }
   0x6   :  { %174 = vsyncadd [#allocation3], 4294964864  ;;  %vm53_vm0 = vcmask 1043456   ;;  %vm49_vm1 = vcmask 31744   ;;  %v29_v0 = vld [vmem:[#allocation2] sm:$0xf] }
   0x7   :  { %v28_v1 = vld [vmem:[%s205_s0] sm:$0xff]  ;;  %v46_v2 = vld [vmem:[#allocation2 + $0x88] sm:$0xff]  ;;  %117 = vmatpush.msk.msra.mxu0 %vm53_vm0, %v29_v0  ;;  %v44_v4 = vld [vmem:[#allocation2 + $0x78] sm:$0xff]  ;;  %s180_s0 = smov [#allocation5]   ;;  %s107_s20 = sshll.u32 %s207_s2, 4  ;;  %s108_s20 = int_to_ptr.hbm [resolvable:$true] %s107_s20 }
   0x8   :  { %79 = vmatpush.msra.mxu1 %v46_v2  ;;  %v45_v3 = vld [vmem:[#allocation2 + $0x80] sm:$0xff]  ;;  %118 = vmatmul.msk.f32.vlgmr.msra.gmra.mxu0 %vm49_vm1, %v28_v1  ;;  %v43_v5 = vld [vmem:[#allocation2 + $0x70] sm:$0xff]  ;;  %v42_v6 = vld [vmem:[#allocation2 + $0x68] sm:$0xff]  ;;  %s105_s1 = sshll.u32 %s180_s0, 4  ;;  %s106_s1 = int_to_ptr.vmem [resolvable:$true] %s105_s1 }
   0x9   :  { %v41_v7 = vld [vmem:[#allocation2 + $0x60] sm:$0xff]  ;;  %v40_v8 = vld [vmem:[#allocation2 + $0x58] sm:$0xff]  ;;  %v39_v9 = vld [vmem:[#allocation2 + $0x50] sm:$0xff] }
   0xa   :  { %80 = vmatpush.msra.mxu1 %v45_v3  ;;  %v38_v10 = vld [vmem:[#allocation2 + $0x48] sm:$0xff]  ;;  %v37_v11 = vld [vmem:[#allocation2 + $0x40] sm:$0xff]  ;;  %v36_v12 = vld [vmem:[#allocation2 + $0x38] sm:$0xff] }
   0xb   :  { %v35_v13 = vld [vmem:[#allocation2 + $0x30] sm:$0xff]  ;;  %v34_v14 = vld [vmem:[#allocation2 + $0x28] sm:$0xff]  ;;  %v33_v15 = vld [vmem:[#allocation2 + $0x20] sm:$0xff] }
   0xc   :  { %81 = vmatpush.msra.mxu1 %v44_v4  ;;  %v32_v16 = vld [vmem:[#allocation2 + $0x18] sm:$0xff]  ;;  %v31_v17 = vld [vmem:[#allocation2 + $0x10] sm:$0xff]  ;;  %v123_v18 = vld [vmem:[#allocation2 + $0x8] ss:$0 sm:$0xff] }
   0xd   :  { %v124_v22 = vld [vmem:[#allocation2 + $0x90] ss:$0 sm:$0xff] }
   0xe   :  { %82 = vmatpush.msra.mxu1 %v43_v5 }
  0x10   :  { %83 = vmatpush.msra.mxu1 %v42_v6 }
  0x12   :  { %84 = vmatpush.msra.mxu1 %v41_v7 }
  0x14   :  { %85 = vmatpush.msra.mxu1 %v40_v8 }
  0x16   :  { %86 = vmatpush.msra.mxu1 %v39_v9 }
  0x18   :  { %87 = vmatpush.msra.mxu1 %v38_v10 }
  0x1a   :  { %88 = vmatpush.msra.mxu1 %v37_v11 }
  0x1c   :  { %89 = vmatpush.msra.mxu1 %v36_v12 }
  0x1e   :  { %90 = vmatpush.msra.mxu1 %v35_v13 }
  0x20   :  { %91 = vmatpush.msra.mxu1 %v34_v14 }
  0x22   :  { %92 = vmatpush.msra.mxu1 %v33_v15 }
  0x24   :  { %93 = vmatpush.msra.mxu1 %v32_v16 }
  0x26   :  { %94 = vmatpush.msra.mxu1 %v31_v17 }
  0x85   :  { %v74_v19 = vpop.f32.mrf.mxu0 }
  0x86   :  { %v75_v20 = vadd.f32 %v123_v18, %v74_v19 }
  0x88   :  { %v77_v21 = vmax.f32 %v75_v20, 0.0 }
  0x8a   :  { %95 = vmatmul.f32.vlgmr.msra.gmra.mxu1 %v77_v21 }
 0x107   :  { %v96_v23 = vpop.f32.mrf.mxu1 }
 0x108   :  { %v97_v24 = vadd.f32 %v124_v22, %v96_v23 }
 0x10a   :  { %99 = vst [vmem:[#allocation5] sm:$0xff] %v97_v24 }
 0x10b   :  { %110 = dma.vmem_to_hbm [thread:$0]  %s106_s1, 128, %s108_s20, [#allocation4]  }
 0x10c   :  { %175 = dma.done.wait [#allocation4], 128  }
 0x10d   :  { %176 = vsyncadd [#allocation4], 4294967168 }
 0x10e   :  { %115 = vsyncpa [#allocation3], 1 }
 0x10f   :  { %116 = vsyncpa [#allocation4], 1 }

</bundles_post_ra>
